<compile_context>
chip_gen: v7x
topology: tpu7x:2x2x1
jax: 0.10.0
libtpu: 0.0.40
codegen_flags: <defaults>
</compile_context>

<pallas_src>
import functools

import jax
import jax.numpy as jnp
from jax.experimental import pallas as pl
from jax.experimental.pallas import tpu as pltpu

LANES = 128
MAX_BLOCK_ROWS = 4096   # (4096, 128) f32 = 2 MiB per input block per buffer
NUM_PARALLEL = 2        # partial-sum rows; lets v7x's 2 TensorCores split the sweep


def _row_mask(blk, blk_rows, rows_valid):
    """Row-level validity mask for the (only) partial last block."""
    row = jax.lax.broadcasted_iota(jnp.int32, (blk_rows, LANES), 0)
    return (blk * blk_rows + row) < rows_valid


def _tile_partial(term, blk_rows):
    """Reduce a (blk_rows, 128) block to one (8, 128) vreg-tile partial.

    The reshape splits the sublane axis exactly along (8, 128) vreg tiles, so
    the axis-0 sum is pure vreg+vreg VPU adds (no XLU)."""
    return term.reshape(blk_rows // 8, 8, LANES).sum(axis=0)


def _wmse_kernel(p_ref, t_ref, w_ref, out_ref, num_acc, den_acc, *,
                 rows_valid, blk_rows, bpc, last_blk):
    c = pl.program_id(0)
    i = pl.program_id(1)
    blk = c * bpc + i                      # nominal (unclamped) block index

    @pl.when(i == 0)
    def _init():
        num_acc[...] = jnp.zeros_like(num_acc)
        den_acc[...] = jnp.zeros_like(den_acc)

    def accumulate(masked):
        p = p_ref[...].astype(jnp.float32)
        t = t_ref[...].astype(jnp.float32)
        w = w_ref[...].astype(jnp.float32)
        d = p - t
        num_t = d * d * w
        den_t = w
        if masked:  # static Python bool -> only traced when actually needed
            valid = _row_mask(blk, blk_rows, rows_valid)
            num_t = jnp.where(valid, num_t, 0.0)
            den_t = jnp.where(valid, den_t, 0.0)
        num_acc[...] += _tile_partial(num_t, blk_rows)
        den_acc[...] += _tile_partial(den_t, blk_rows)

    last_partial = (rows_valid % blk_rows) != 0   # static at trace time

    @pl.when(blk < last_blk)                       # bulk blocks: no masking
    def _bulk():
        accumulate(False)

    @pl.when(blk == last_blk)                      # last block: mask iff partial
    def _last():
        accumulate(last_partial)
    # blk > last_blk (clamped overrun blocks): skipped entirely.

    @pl.when(i == pl.num_programs(1) - 1)
    def _finalize():
        out_ref[0, 0:1, :] = jnp.sum(num_acc[...], axis=0, keepdims=True)
        out_ref[0, 1:2, :] = jnp.sum(den_acc[...], axis=0, keepdims=True)


def _mse_kernel(p_ref, t_ref, out_ref, num_acc, *,
                rows_valid, blk_rows, bpc, last_blk):
    """Unweighted fast path: numerator only; denominator = n on the host."""
    c = pl.program_id(0)
    i = pl.program_id(1)
    blk = c * bpc + i

    @pl.when(i == 0)
    def _init():
        num_acc[...] = jnp.zeros_like(num_acc)

    def accumulate(masked):
        d = p_ref[...].astype(jnp.float32) - t_ref[...].astype(jnp.float32)
        num_t = d * d
        if masked:
            valid = _row_mask(blk, blk_rows, rows_valid)
            num_t = jnp.where(valid, num_t, 0.0)
        num_acc[...] += _tile_partial(num_t, blk_rows)

    last_partial = (rows_valid % blk_rows) != 0

    @pl.when(blk < last_blk)
    def _bulk():
        accumulate(False)

    @pl.when(blk == last_blk)
    def _last():
        accumulate(last_partial)

    @pl.when(i == pl.num_programs(1) - 1)
    def _finalize():
        out_ref[0, 0:1, :] = jnp.sum(num_acc[...], axis=0, keepdims=True)


def _partial_sums(kernel, arrays, rows, out_minor):
    """Run the reduction kernel over (rows, 128)-shaped inputs.

    Returns per-parallel-slice partial sums of shape (n_par, out_minor, 128);
    the tiny final reduction happens in the JAX wrapper."""
    # Block rows are always a multiple of 8 so the in-kernel (.., 8, 128)
    # tile reduction is exact; a rows-overrun in the last block is masked.
    blk_rows = min(MAX_BLOCK_ROWS, pl.cdiv(rows, 8) * 8)
    total_blocks = pl.cdiv(rows, blk_rows)
    n_par = min(NUM_PARALLEL, total_blocks)
    bpc = pl.cdiv(total_blocks, n_par)      # row-blocks per parallel slice
    last_blk = total_blocks - 1

    def in_map(c, i):
        # Clamp so the DMA never walks past the array; overrun blocks are
        # skipped inside the kernel (blk > last_blk).
        return (jnp.minimum(c * bpc + i, last_blk), 0)

    in_spec = pl.BlockSpec((blk_rows, LANES), in_map)
    out_spec = pl.BlockSpec((1, out_minor, LANES), lambda c, i: (c, 0, 0))

    # Explicit scoped-VMEM budget: double-buffered inputs + generous headroom
    # for the tiny accumulators / outputs / compiler scratch.  Well inside the
    # physical VMEM of v5e/v6e (128 MiB) and v7x (64 MiB).
    block_bytes = blk_rows * LANES * 4
    vmem_limit = len(arrays) * 2 * block_bytes + (8 << 20)

    elems = rows * LANES
    itemsize = arrays[0].dtype.itemsize
    cost = pl.CostEstimate(
        flops=5 * elems,
        transcendentals=0,
        bytes_accessed=len(arrays) * elems * itemsize + n_par * out_minor * LANES * 4,
    )

    return pl.pallas_call(
        functools.partial(kernel, rows_valid=rows, blk_rows=blk_rows,
                          bpc=bpc, last_blk=last_blk),
        out_shape=jax.ShapeDtypeStruct((n_par, out_minor, LANES), jnp.float32),
        grid_spec=pltpu.PrefetchScalarGridSpec(
            num_scalar_prefetch=0,
            grid=(n_par, bpc),
            in_specs=[in_spec] * len(arrays),
            out_specs=out_spec,
            scratch_shapes=[pltpu.VMEM((8, LANES), jnp.float32)
                            for _ in range(out_minor)],
        ),
        compiler_params=pltpu.CompilerParams(
            dimension_semantics=("parallel", "arbitrary"),
            vmem_limit_bytes=vmem_limit,
        ),
        cost_estimate=cost,
    )(*arrays)


@jax.jit
def weighted_mse_loss(pred, target, weight=None):
    """Matches WeightedMSELoss.forward: sum(w*(p-t)^2) / sum(w)."""
    n = pred.size
    assert target.size == n
    flat_p = jnp.ravel(pred)
    flat_t = jnp.ravel(target)
    flat_w = None if weight is None else jnp.ravel(weight)
    if flat_w is not None:
        assert flat_w.size == n

    main_rows = n // LANES
    main_n = main_rows * LANES

    num = jnp.float32(0.0)
    den = jnp.float32(0.0)

    if main_rows > 0:
        # Lane-aligned prefix; for n % 128 == 0 this is a free bitcast reshape.
        p2 = flat_p[:main_n].reshape(main_rows, LANES)
        t2 = flat_t[:main_n].reshape(main_rows, LANES)
        if flat_w is not None:
            w2 = flat_w[:main_n].reshape(main_rows, LANES)
            out = _partial_sums(_wmse_kernel, [p2, t2, w2], main_rows, out_minor=2)
            num = jnp.sum(out[:, 0, :])
            den = jnp.sum(out[:, 1, :])
        else:
            out = _partial_sums(_mse_kernel, [p2, t2], main_rows, out_minor=1)
            num = jnp.sum(out[:, 0, :])
            den = jnp.float32(main_n)

    if main_n < n:
        # Ragged tail (< 128 elements): plain jnp, no padded HBM copy.
        tp = flat_p[main_n:].astype(jnp.float32)
        tt = flat_t[main_n:].astype(jnp.float32)
        d2 = (tp - tt) ** 2.0
        if flat_w is not None:
            tw = flat_w[main_n:].astype(jnp.float32)
            num = num + jnp.sum(d2 * tw)
            den = den + jnp.sum(tw)
        else:
            num = num + jnp.sum(d2)
            den = den + jnp.float32(n - main_n)

    return num / den


def _reference(pred, target, weight=None):
    if weight is None:
        weight = jnp.ones_like(target)
    d2 = (jnp.ravel(pred).astype(jnp.float32)
          - jnp.ravel(target).astype(jnp.float32)) ** 2.0
    fw = jnp.ravel(weight).astype(jnp.float32)
    return jnp.sum(d2 * fw) / jnp.sum(fw)


if __name__ == "__main__":
    key = jax.random.PRNGKey(0)
    k1, k2, k3 = jax.random.split(key, 3)

    # NCHW-shaped example inputs, as the PyTorch module would receive.
    shape = (2, 4, 16, 16)
    pred = jax.random.normal(k1, shape, dtype=jnp.float32)
    target = jax.random.normal(k2, shape, dtype=jnp.float32)
    weight = jax.random.uniform(k3, shape, dtype=jnp.float32)

    # With explicit weight.
    loss_w = jax.block_until_ready(weighted_mse_loss(pred, target, weight))
    ref_w = _reference(pred, target, weight)
    assert jnp.allclose(loss_w, ref_w, rtol=1e-5, atol=1e-6), (loss_w, ref_w)

    # With default (ones) weight — exercises the 2-input fast path.
    loss_u = jax.block_until_ready(weighted_mse_loss(pred, target))
    ref_u = _reference(pred, target)
    assert jnp.allclose(loss_u, ref_u, rtol=1e-5, atol=1e-6), (loss_u, ref_u)

    # Size not a multiple of 128 — exercises the jnp tail path and the
    # rows-padded (9 -> 16 row) masked last block.
    k4, k5, k6 = jax.random.split(k3, 3)
    shape2 = (3, 5, 7, 11)   # 1155 elements
    pred2 = jax.random.normal(k4, shape2, dtype=jnp.float32)
    target2 = jax.random.normal(k5, shape2, dtype=jnp.float32)
    weight2 = jax.random.uniform(k6, shape2, dtype=jnp.float32)
    loss2 = jax.block_until_ready(weighted_mse_loss(pred2, target2, weight2))
    ref2 = _reference(pred2, target2, weight2)
    assert jnp.allclose(loss2, ref2, rtol=1e-5, atol=1e-6), (loss2, ref2)

    # Multi-block / 2-way-parallel / clamped-overrun-block path:
    # 1,572,864 elements -> 12288 rows -> 3 blocks of 4096 rows -> 2 slices.
    k7, k8, k9 = jax.random.split(k6, 3)
    shape3 = (3, 8, 256, 256)
    pred3 = jax.random.normal(k7, shape3, dtype=jnp.float32)
    target3 = jax.random.normal(k8, shape3, dtype=jnp.float32)
    weight3 = jax.random.uniform(k9, shape3, dtype=jnp.float32)
    loss3 = jax.block_until_ready(weighted_mse_loss(pred3, target3, weight3))
    ref3 = _reference(pred3, target3, weight3)
    assert jnp.allclose(loss3, ref3, rtol=1e-4, atol=1e-6), (loss3, ref3)

    print("KERNEL_OK")
</pallas_src>

<mosaic_0001>
module attributes {stable_mosaic.version = 11 : i64} {
  func.func @_wmse_kernel(%arg0: i32, %arg1: i32, %arg2: memref<16x128xf32, #tpu.memory_space<vmem>>, %arg3: memref<16x128xf32, #tpu.memory_space<vmem>>, %arg4: memref<16x128xf32, #tpu.memory_space<vmem>>, %arg5: memref<1x2x128xf32, #tpu.memory_space<vmem>>, %arg6: memref<8x128xf32, #tpu.memory_space<vmem>>, %arg7: memref<8x128xf32, #tpu.memory_space<vmem>>) attributes {dimension_semantics = [#tpu.dimension_semantics<parallel>, #tpu.dimension_semantics<arbitrary>], iteration_bounds = array<i64: 1, 1>, scalar_prefetch = 0 : i64, scratch_operands = 2 : i64, tpu.core_type = #tpu.core_type<tc>, window_params = [{transform_indices = @transform_0, window_bounds = array<i64: 16, 128>}, {transform_indices = @transform_1, window_bounds = array<i64: 16, 128>}, {transform_indices = @transform_2, window_bounds = array<i64: 16, 128>}, {transform_indices = @transform_3, window_bounds = array<i64: 1, 2, 128>}]} {
    %c1_i32 = arith.constant 1 : i32
    %0 = arith.muli %arg0, %c1_i32 : i32
    %1 = arith.addi %0, %arg1 : i32
    %c0_i32 = arith.constant 0 : i32
    %2 = arith.cmpi eq, %arg1, %c0_i32 : i32
    %3 = arith.extui %2 : i1 to i32
    %c0_i32_0 = arith.constant 0 : i32
    %4 = arith.cmpi ne, %3, %c0_i32_0 : i32
    scf.if %4 {
      %cst = arith.constant 0.000000e+00 : f32
      %14 = vector.broadcast %cst : f32 to vector<8x128xf32>
      %c0 = arith.constant 0 : index
      %c0_7 = arith.constant 0 : index
      %15 = vector.load %arg6[%c0, %c0_7] : memref<8x128xf32, #tpu.memory_space<vmem>>, vector<8x128xf32>
      tpu.vector_store %arg6[%c0, %c0_7], %14 {strides = array<i32>} : memref<8x128xf32, #tpu.memory_space<vmem>>, vector<8x128xf32>,
      %cst_8 = arith.constant 0.000000e+00 : f32
      %16 = vector.broadcast %cst_8 : f32 to vector<8x128xf32>
      %c0_9 = arith.constant 0 : index
      %c0_10 = arith.constant 0 : index
      %17 = vector.load %arg7[%c0_9, %c0_10] : memref<8x128xf32, #tpu.memory_space<vmem>>, vector<8x128xf32>
      tpu.vector_store %arg7[%c0_9, %c0_10], %16 {strides = array<i32>} : memref<8x128xf32, #tpu.memory_space<vmem>>, vector<8x128xf32>,
    } else {
    }
    %c0_i32_1 = arith.constant 0 : i32
    %5 = arith.cmpi slt, %1, %c0_i32_1 : i32
    %6 = arith.extui %5 : i1 to i32
    %c0_i32_2 = arith.constant 0 : i32
    %7 = arith.cmpi ne, %6, %c0_i32_2 : i32
    scf.if %7 {
      %c0 = arith.constant 0 : index
      %c0_7 = arith.constant 0 : index
      %14 = vector.load %arg2[%c0, %c0_7] : memref<16x128xf32, #tpu.memory_space<vmem>>, vector<16x128xf32>
      %c0_8 = arith.constant 0 : index
      %c0_9 = arith.constant 0 : index
      %15 = vector.load %arg3[%c0_8, %c0_9] : memref<16x128xf32, #tpu.memory_space<vmem>>, vector<16x128xf32>
      %c0_10 = arith.constant 0 : index
      %c0_11 = arith.constant 0 : index
      %16 = vector.load %arg4[%c0_10, %c0_11] : memref<16x128xf32, #tpu.memory_space<vmem>>, vector<16x128xf32>
      %17 = arith.subf %14, %15 : vector<16x128xf32>
      %18 = arith.mulf %17, %17 : vector<16x128xf32>
      %19 = arith.mulf %18, %16 : vector<16x128xf32>
      %c0_12 = arith.constant 0 : index
      %c0_13 = arith.constant 0 : index
      %20 = vector.load %arg6[%c0_12, %c0_13] : memref<8x128xf32, #tpu.memory_space<vmem>>, vector<8x128xf32>
      %21 = vector.shape_cast %19 : vector<16x128xf32> to vector<2x8x128xf32>
      %cst = arith.constant dense<0.000000e+00> : vector<8x128xf32>
      %22 = vector.multi_reduction <add>, %21, %cst [0] : vector<2x8x128xf32> to vector<8x128xf32>
      %23 = arith.addf %20, %22 : vector<8x128xf32>
      %c0_14 = arith.constant 0 : index
      %c0_15 = arith.constant 0 : index
      %24 = vector.load %arg6[%c0_14, %c0_15] : memref<8x128xf32, #tpu.memory_space<vmem>>, vector<8x128xf32>
      tpu.vector_store %arg6[%c0_14, %c0_15], %23 {strides = array<i32>} : memref<8x128xf32, #tpu.memory_space<vmem>>, vector<8x128xf32>,
      %c0_16 = arith.constant 0 : index
      %c0_17 = arith.constant 0 : index
      %25 = vector.load %arg7[%c0_16, %c0_17] : memref<8x128xf32, #tpu.memory_space<vmem>>, vector<8x128xf32>
      %26 = vector.shape_cast %16 : vector<16x128xf32> to vector<2x8x128xf32>
      %cst_18 = arith.constant dense<0.000000e+00> : vector<8x128xf32>
      %27 = vector.multi_reduction <add>, %26, %cst_18 [0] : vector<2x8x128xf32> to vector<8x128xf32>
      %28 = arith.addf %25, %27 : vector<8x128xf32>
      %c0_19 = arith.constant 0 : index
      %c0_20 = arith.constant 0 : index
      %29 = vector.load %arg7[%c0_19, %c0_20] : memref<8x128xf32, #tpu.memory_space<vmem>>, vector<8x128xf32>
      tpu.vector_store %arg7[%c0_19, %c0_20], %28 {strides = array<i32>} : memref<8x128xf32, #tpu.memory_space<vmem>>, vector<8x128xf32>,
    } else {
    }
    %c0_i32_3 = arith.constant 0 : i32
    %8 = arith.cmpi eq, %1, %c0_i32_3 : i32
    %9 = arith.extui %8 : i1 to i32
    %c0_i32_4 = arith.constant 0 : i32
    %10 = arith.cmpi ne, %9, %c0_i32_4 : i32
    scf.if %10 {
      %c0 = arith.constant 0 : index
      %c0_7 = arith.constant 0 : index
      %14 = vector.load %arg2[%c0, %c0_7] : memref<16x128xf32, #tpu.memory_space<vmem>>, vector<16x128xf32>
      %c0_8 = arith.constant 0 : index
      %c0_9 = arith.constant 0 : index
      %15 = vector.load %arg3[%c0_8, %c0_9] : memref<16x128xf32, #tpu.memory_space<vmem>>, vector<16x128xf32>
      %c0_10 = arith.constant 0 : index
      %c0_11 = arith.constant 0 : index
      %16 = vector.load %arg4[%c0_10, %c0_11] : memref<16x128xf32, #tpu.memory_space<vmem>>, vector<16x128xf32>
      %17 = arith.subf %14, %15 : vector<16x128xf32>
      %18 = arith.mulf %17, %17 : vector<16x128xf32>
      %19 = arith.mulf %18, %16 : vector<16x128xf32>
      %c0_12 = arith.constant 0 : index
      %c0_13 = arith.constant 0 : index
      %20 = vector.load %arg6[%c0_12, %c0_13] : memref<8x128xf32, #tpu.memory_space<vmem>>, vector<8x128xf32>
      %21 = vector.shape_cast %19 : vector<16x128xf32> to vector<2x8x128xf32>
      %cst = arith.constant dense<0.000000e+00> : vector<8x128xf32>
      %22 = vector.multi_reduction <add>, %21, %cst [0] : vector<2x8x128xf32> to vector<8x128xf32>
      %23 = arith.addf %20, %22 : vector<8x128xf32>
      %c0_14 = arith.constant 0 : index
      %c0_15 = arith.constant 0 : index
      %24 = vector.load %arg6[%c0_14, %c0_15] : memref<8x128xf32, #tpu.memory_space<vmem>>, vector<8x128xf32>
      tpu.vector_store %arg6[%c0_14, %c0_15], %23 {strides = array<i32>} : memref<8x128xf32, #tpu.memory_space<vmem>>, vector<8x128xf32>,
      %c0_16 = arith.constant 0 : index
      %c0_17 = arith.constant 0 : index
      %25 = vector.load %arg7[%c0_16, %c0_17] : memref<8x128xf32, #tpu.memory_space<vmem>>, vector<8x128xf32>
      %26 = vector.shape_cast %16 : vector<16x128xf32> to vector<2x8x128xf32>
      %cst_18 = arith.constant dense<0.000000e+00> : vector<8x128xf32>
      %27 = vector.multi_reduction <add>, %26, %cst_18 [0] : vector<2x8x128xf32> to vector<8x128xf32>
      %28 = arith.addf %25, %27 : vector<8x128xf32>
      %c0_19 = arith.constant 0 : index
      %c0_20 = arith.constant 0 : index
      %29 = vector.load %arg7[%c0_19, %c0_20] : memref<8x128xf32, #tpu.memory_space<vmem>>, vector<8x128xf32>
      tpu.vector_store %arg7[%c0_19, %c0_20], %28 {strides = array<i32>} : memref<8x128xf32, #tpu.memory_space<vmem>>, vector<8x128xf32>,
    } else {
    }
    %c0_i32_5 = arith.constant 0 : i32
    %11 = arith.cmpi eq, %arg1, %c0_i32_5 : i32
    %12 = arith.extui %11 : i1 to i32
    %c0_i32_6 = arith.constant 0 : i32
    %13 = arith.cmpi ne, %12, %c0_i32_6 : i32
    scf.if %13 {
      %c0 = arith.constant 0 : index
      %c0_7 = arith.constant 0 : index
      %14 = vector.load %arg6[%c0, %c0_7] : memref<8x128xf32, #tpu.memory_space<vmem>>, vector<8x128xf32>
      %cst = arith.constant dense<0.000000e+00> : vector<128xf32>
      %15 = vector.multi_reduction <add>, %14, %cst [0] : vector<8x128xf32> to vector<128xf32>
      %16 = vector.shape_cast %15 : vector<128xf32> to vector<1x128xf32>
      %c0_8 = arith.constant 0 : index
      %c0_9 = arith.constant 0 : index
      %c0_10 = arith.constant 0 : index
      %17 = vector.load %arg5[%c0_8, %c0_9, %c0_10] : memref<1x2x128xf32, #tpu.memory_space<vmem>>, vector<1x1x128xf32>
      %18 = vector.shape_cast %17 : vector<1x1x128xf32> to vector<1x128xf32>
      %19 = vector.shape_cast %16 : vector<1x128xf32> to vector<1x1x128xf32>
      tpu.vector_store %arg5[%c0_8, %c0_9, %c0_10], %19 {strides = array<i32>} : memref<1x2x128xf32, #tpu.memory_space<vmem>>, vector<1x1x128xf32>,
      %c0_11 = arith.constant 0 : index
      %c0_12 = arith.constant 0 : index
      %20 = vector.load %arg7[%c0_11, %c0_12] : memref<8x128xf32, #tpu.memory_space<vmem>>, vector<8x128xf32>
      %cst_13 = arith.constant dense<0.000000e+00> : vector<128xf32>
      %21 = vector.multi_reduction <add>, %20, %cst_13 [0] : vector<8x128xf32> to vector<128xf32>
      %22 = vector.shape_cast %21 : vector<128xf32> to vector<1x128xf32>
      %c0_14 = arith.constant 0 : index
      %c1 = arith.constant 1 : index
      %c0_15 = arith.constant 0 : index
      %23 = vector.load %arg5[%c0_14, %c1, %c0_15] : memref<1x2x128xf32, #tpu.memory_space<vmem>>, vector<1x1x128xf32>
      %24 = vector.shape_cast %23 : vector<1x1x128xf32> to vector<1x128xf32>
      %25 = vector.shape_cast %22 : vector<1x128xf32> to vector<1x1x128xf32>
      tpu.vector_store %arg5[%c0_14, %c1, %c0_15], %25 {strides = array<i32>} : memref<1x2x128xf32, #tpu.memory_space<vmem>>, vector<1x1x128xf32>,
    } else {
    }
    return
  }
  func.func @transform_0(%arg0: i32, %arg1: i32) -> (i32, i32) {
    %c1_i32 = arith.constant 1 : i32
    %0 = arith.muli %arg0, %c1_i32 : i32
    %1 = arith.addi %0, %arg1 : i32
    %c0_i32 = arith.constant 0 : i32
    %2 = arith.minsi %1, %c0_i32 : i32
    %c0_i32_0 = arith.constant 0 : i32
    %c0_i32_1 = arith.constant 0 : i32
    return %2, %c0_i32_0 : i32, i32
  }
  func.func @transform_1(%arg0: i32, %arg1: i32) -> (i32, i32) {
    %c1_i32 = arith.constant 1 : i32
    %0 = arith.muli %arg0, %c1_i32 : i32
    %1 = arith.addi %0, %arg1 : i32
    %c0_i32 = arith.constant 0 : i32
    %2 = arith.minsi %1, %c0_i32 : i32
    %c0_i32_0 = arith.constant 0 : i32
    %c0_i32_1 = arith.constant 0 : i32
    return %2, %c0_i32_0 : i32, i32
  }
  func.func @transform_2(%arg0: i32, %arg1: i32) -> (i32, i32) {
    %c1_i32 = arith.constant 1 : i32
    %0 = arith.muli %arg0, %c1_i32 : i32
    %1 = arith.addi %0, %arg1 : i32
    %c0_i32 = arith.constant 0 : i32
    %2 = arith.minsi %1, %c0_i32 : i32
    %c0_i32_0 = arith.constant 0 : i32
    %c0_i32_1 = arith.constant 0 : i32
    return %2, %c0_i32_0 : i32, i32
  }
  func.func @transform_3(%arg0: i32, %arg1: i32) -> (i32, i32, i32) {
    %c0_i32 = arith.constant 0 : i32
    %c0_i32_0 = arith.constant 0 : i32
    %c0_i32_1 = arith.constant 0 : i32
    return %arg0, %c0_i32, %c0_i32_0 : i32, i32, i32
  }
}

</mosaic_0001>

<bundles_post_ra>
// kernel: weighted_mse_loss.1
= control target key start
LH: loop header
LB: loop body
LE: loop exit
PB: predicated region body
PF: predicated region fallthrough
CT: control target
= control target key end

     0   :  { %s250_s0 = inlined_call_operand.vmem [shape: f32[16,128], index: 0, kind: input, shape index: {}]   ;;  %s251_s1 = inlined_call_operand.vmem [shape: f32[16,128], index: 1, kind: input, shape index: {}]   ;;  %s252_s2 = inlined_call_operand.vmem [shape: f32[16,128], index: 2, kind: input, shape index: {}]   ;;  %s253_s3 = inlined_call_operand.vmem [shape: f32[1,2,128], index: 3, kind: output, shape index: {}]  }
   0x1   :  { %v145_v0 = vld [vmem:[%s250_s0] sm:$0xff]  ;;  %v146_v1 = vld [vmem:[%s250_s0 + $0x8] sm:$0xff] }
   0x2   :  { %v147_v2 = vld [vmem:[%s251_s1] sm:$0xff]  ;;  %v148_v3 = vld [vmem:[%s251_s1 + $0x8] sm:$0xff] }
   0x3   :  { %v149_v4 = vld [vmem:[%s252_s2] sm:$0xff]  ;;  %v150_v5 = vld [vmem:[%s252_s2 + $0x8] sm:$0xff]  ;;  %v151_v6 = vsub.f32 %v145_v0, %v147_v2  ;;  %v152_v7 = vsub.f32 %v146_v1, %v148_v3 }
   0x4   :  { %v162_v8 = vadd.f32 %v150_v5, %v149_v4 }
   0x5   :  { %v153_v9 = vmul.f32 %v151_v6, %v151_v6  ;;  %v154_v10 = vmul.f32 %v152_v7, %v152_v7 }
   0x6   :  { %v177_v11 = vrot.slane %v162_v8, 4 }
   0x7   :  { %v155_v12 = vmul.f32 %v153_v9, %v149_v4  ;;  %v156_v13 = vmul.f32 %v154_v10, %v150_v5 }
   0x8   :  { %v178_v14 = vadd.f32 %v177_v11, %v162_v8 }
   0x9   :  { %v158_v15 = vadd.f32 %v156_v13, %v155_v12 }
   0xa   :  { %v179_v16 = vrot.slane %v178_v14, 2 }
   0xb   :  { %v169_v17 = vrot.slane %v158_v15, 4 }
   0xc   :  { %v180_v18 = vadd.f32 %v179_v16, %v178_v14 }
   0xd   :  { %v170_v19 = vadd.f32 %v169_v17, %v158_v15 }
   0xe   :  { %v181_v20 = vrot.slane %v180_v18, 1 }
   0xf   :  { %v171_v21 = vrot.slane %v170_v19, 2 }
  0x10   :  { %v182_v22 = vadd.f32 %v181_v20, %v180_v18 }
  0x11   :  { %v172_v23 = vadd.f32 %v171_v21, %v170_v19 }
  0x12   :  { %183 = vst [vmem:[%s253_s3 + $0x1] sm:$0x1] %v182_v22 }
  0x13   :  { %v173_v24 = vrot.slane %v172_v23, 1 }
  0x15   :  { %v174_v25 = vadd.f32 %v173_v24, %v172_v23 }
  0x17   :  { %175 = vst [vmem:[%s253_s3] sm:$0x1] %v174_v25 }

</bundles_post_ra>
